<compile_context>
chip_gen: v6e
topology: v6e:2x2x1
jax: 0.10.0
libtpu: 0.0.40
codegen_flags: <defaults>
</compile_context>

<pallas_src>
import functools
from typing import NamedTuple

import jax
import jax.numpy as jnp
from jax.experimental import pallas as pl
from jax.experimental.pallas import tpu as pltpu


# --------------------------------------------------------------------------- #
# helpers
# --------------------------------------------------------------------------- #
def _round_up(a: int, m: int) -> int:
    return ((a + m - 1) // m) * m


def _cdiv(a: int, b: int) -> int:
    return (a + b - 1) // b


def _usable_vmem_bytes() -> int:
    """~75% of physical VMEM (~96 MiB on v5e/v6e, ~48 MiB on v7x)."""
    cap = None
    try:
        cap = int(pltpu.get_tpu_info().vmem_capacity_bytes)
    except Exception:
        cap = None
    if not cap:
        try:
            kind = jax.devices()[0].device_kind.lower()
        except Exception:
            kind = ""
        cap = (64 << 20) if "v7" in kind else (128 << 20)
    return (cap * 3) // 4


def _mxu_lane_multiple() -> int:
    """256 on v6e/v7x (256-wide MXU), 128 on v5e and older."""
    try:
        kind = jax.devices()[0].device_kind.lower()
    except Exception:
        kind = ""
    for old in ("v2", "v3", "v4", "v5"):
        if old in kind:
            return 128
    return 256


def _pad_feature(d: int, big: int) -> int:
    # 256-multiples only pay off (and only apply) once the dim is >= 256.
    return _round_up(d, big if d >= 256 else 128)


class ZnnPlan(NamedTuple):
    """Static tiling plan (all ints -> hashable -> usable as jit static arg)."""
    din: int
    h: int
    dout: int
    din_p: int
    h_p: int
    dout_p: int
    th: int        # hidden (reduction) tile width; divides h_p
    row_tile: int  # nominal row tile


# --------------------------------------------------------------------------- #
# one-time weight preparation (runs OUTSIDE the jitted forward)
# --------------------------------------------------------------------------- #
def prepare_weights(w1, w2, *, compute_dtype=jnp.bfloat16, row_tile=256,
                    max_h_tile=None):
    """Transpose torch-layout weights, cast to the compute dtype (bf16 default),
    pad to MXU/lane-friendly multiples and pick the hidden-axis tile `th`.

      w1: [H, Din]   (torch nn.Linear(Din, H).weight)
      w2: [Dout, H]  (torch nn.Linear(H, Dout).weight)

    Returns (w1_p [Din_p, H_p], w2_p [H_p, Dout_p], plan).
    """
    H, Din = w1.shape
    Dout, H2 = w2.shape
    if H != H2:
        raise ValueError("w1 / w2 hidden dims disagree")

    big = _mxu_lane_multiple()
    din_p = _round_up(Din, 128)
    h_p = _pad_feature(H, big)
    dout_p = _pad_feature(Dout, big)

    w_item = jnp.dtype(compute_dtype).itemsize
    usable = _usable_vmem_bytes()
    tm = row_tile
    # Non-weight VMEM: double-buffered x / out tiles + f32 output accumulator.
    io_bytes = 2 * tm * (din_p * w_item + dout_p * 4) + tm * dout_p * 4

    def fits(th_):
        # Conservatively budget 2 buffers per weight block (default pipelining)
        # plus the f32 hidden intermediate for one chunk.
        w_bytes = 2 * (din_p * th_ + th_ * dout_p) * w_item
        return w_bytes + tm * th_ * 4 + io_bytes <= usable

    th = h_p
    if not fits(th):
        # H-tiled fallback: stream W1 / W2 in chunks along the hidden axis and
        # accumulate the second matmul into an f32 VMEM scratch.
        unit = big if (h_p % big == 0) else 128
        per_unit = (2 * (din_p + dout_p) * w_item + tm * 4) * unit
        budget = max(usable - io_bytes, per_unit)
        th = min(h_p, max(unit, (budget // per_unit) * unit))
    if max_h_tile is not None:
        th = min(th, max(128, _round_up(int(max_h_tile), 128)))
    th = min(th, h_p)
    # Hidden pad must be an exact multiple of th: a partial weight block would
    # feed garbage into the accumulator and pollute valid output rows.
    h_p = _round_up(h_p, th)

    w1_p = jnp.asarray(w1, dtype=compute_dtype).T   # [Din, H]
    w2_p = jnp.asarray(w2, dtype=compute_dtype).T   # [H, Dout]
    if (din_p, h_p) != (Din, H):
        w1_p = jnp.pad(w1_p, ((0, din_p - Din), (0, h_p - H)))
    if (h_p, dout_p) != (H, Dout):
        w2_p = jnp.pad(w2_p, ((0, h_p - H), (0, dout_p - Dout)))

    plan = ZnnPlan(din=Din, h=H, dout=Dout, din_p=din_p, h_p=h_p,
                   dout_p=dout_p, th=th, row_tile=row_tile)
    return w1_p, w2_p, plan


# --------------------------------------------------------------------------- #
# kernel
# --------------------------------------------------------------------------- #
def _znn_kernel(x_ref, w1_ref, w2_ref, o_ref, acc_ref):
    c = pl.program_id(1)                       # hidden (reduction) grid axis

    @pl.when(c == 0)
    def _init():
        acc_ref[...] = jnp.zeros_like(acc_ref)

    # hidden chunk: relu(x @ W1[:, c]) — f32 MXU accumulation, compute dtype feed
    h = jnp.dot(x_ref[...], w1_ref[...], preferred_element_type=jnp.float32)
    h = jnp.maximum(h, 0.0).astype(w2_ref.dtype)
    # out += hidden_chunk @ W2[c, :]
    acc_ref[...] += jnp.dot(h, w2_ref[...], preferred_element_type=jnp.float32)

    @pl.when(c == pl.num_programs(1) - 1)
    def _finalize():
        o_ref[...] = acc_ref[...].astype(o_ref.dtype)


# --------------------------------------------------------------------------- #
# jitted forward
# --------------------------------------------------------------------------- #
@functools.partial(jax.jit, static_argnames=("plan",))
def znn_forward(x, w1_p, w2_p, *, plan: ZnnPlan):
    """Fused two-layer MLP (no biases): relu(x @ W1) @ W2.

    x:    [N, Din]
    w1_p: [Din_p, H_p]   from prepare_weights (pre-transposed / padded / cast)
    w2_p: [H_p, Dout_p]  from prepare_weights
    """
    N, Din = x.shape
    if Din != plan.din:
        raise ValueError("x feature dim does not match the weight plan")

    out_dtype = x.dtype
    cdt = w1_p.dtype
    x = x.astype(cdt)                       # per-call activation cast (cheap)
    if plan.din_p != Din:
        # Lane pad of the contraction dim is semantically required (zero cols
        # against zero weight rows). Rows are NOT padded: the partial tail row
        # block is masked by Pallas.
        x = jnp.pad(x, ((0, 0), (0, plan.din_p - Din)))

    sub = 16 if jnp.dtype(cdt) == jnp.dtype(jnp.bfloat16) else 8
    th = plan.th
    row_tile = plan.row_tile
    if th > 2048:
        row_tile = min(row_tile, 128)       # bound the (tm, th) f32 intermediate
    if N >= 2 * row_tile:
        tm = row_tile
    else:
        # Guarantee >= 2 grid steps when N allows: megacore sharding on v7x and
        # x/out double-buffering for small/medium N.
        tm = max(sub, _round_up(_cdiv(N, 2), sub))
    n_rows = _cdiv(N, tm)
    n_h = plan.h_p // th

    x_item = jnp.dtype(cdt).itemsize
    out_item = jnp.dtype(out_dtype).itemsize
    w_item = jnp.dtype(w1_p.dtype).itemsize

    # VMEM budget: per-step weight blocks (2 buffers), double-buffered x / out
    # tiles, f32 accumulator scratch and the f32 hidden chunk; *1.2 headroom,
    # capped by the per-generation usable VMEM (no fixed 32 MiB clamp).
    needed = (2 * (plan.din_p * th + th * plan.dout_p) * w_item
              + 2 * tm * (plan.din_p * x_item + plan.dout_p * out_item)
              + tm * plan.dout_p * 4
              + tm * th * 4)
    vmem_limit = int(min(_usable_vmem_bytes(), max(int(needed * 1.2), 24 << 20)))

    flops = 2 * N * plan.h_p * (plan.din_p + plan.dout_p)
    w_bytes = (plan.din_p * plan.h_p + plan.h_p * plan.dout_p) * w_item
    bytes_accessed = (N * plan.din_p * x_item
                      + (w_bytes if n_h == 1 else w_bytes * n_rows)
                      + N * plan.dout_p * out_item)

    out_p = pl.pallas_call(
        _znn_kernel,
        out_shape=jax.ShapeDtypeStruct((N, plan.dout_p), out_dtype),
        grid=(n_rows, n_h),                 # reduction axis innermost
        in_specs=[
            # x: one row tile, constant across the hidden axis (no re-DMA).
            pl.BlockSpec((tm, plan.din_p), lambda i, c: (i, 0)),
            # Weights: constant block index when n_h == 1 -> VMEM resident;
            # otherwise streamed chunk-by-chunk along the hidden axis.
            pl.BlockSpec((plan.din_p, th), lambda i, c: (0, c)),
            pl.BlockSpec((th, plan.dout_p), lambda i, c: (c, 0)),
        ],
        # Lane-dense output tile; same block across the reduction axis.
        out_specs=pl.BlockSpec((tm, plan.dout_p), lambda i, c: (i, 0)),
        scratch_shapes=[pltpu.VMEM((tm, plan.dout_p), jnp.float32)],
        compiler_params=pltpu.CompilerParams(
            dimension_semantics=("parallel", "arbitrary"),
            vmem_limit_bytes=vmem_limit,
        ),
        cost_estimate=pl.CostEstimate(
            flops=flops, transcendentals=0, bytes_accessed=bytes_accessed),
    )(x, w1_p, w2_p)

    if plan.dout_p != plan.dout:
        out_p = out_p[:, :plan.dout]
    return out_p


# --------------------------------------------------------------------------- #
# reference + tests
# --------------------------------------------------------------------------- #
def _reference(x, w1, w2):
    h = jnp.maximum(jnp.dot(x, w1.T, precision=jax.lax.Precision.HIGHEST), 0.0)
    return jnp.dot(h, w2.T, precision=jax.lax.Precision.HIGHEST)


if __name__ == "__main__":
    N, Din, H, Dout = 256, 128, 256, 128

    key = jax.random.PRNGKey(0)
    kx, k1, k2 = jax.random.split(key, 3)
    x = jax.random.normal(kx, (N, Din), dtype=jnp.float32)
    # PyTorch nn.Linear weight layout is [out_features, in_features].
    w1 = jax.random.normal(k1, (H, Din), dtype=jnp.float32) * 0.1   # linear1.weight
    w2 = jax.random.normal(k2, (Dout, H), dtype=jnp.float32) * 0.1  # linear2.weight

    ref = _reference(x, w1, w2)

    # 1) Default bf16 compute path (f32 accumulation, f32 output).
    w1_bf, w2_bf, plan_bf = prepare_weights(w1, w2)          # once, outside jit
    out_bf = jax.block_until_ready(znn_forward(x, w1_bf, w2_bf, plan=plan_bf))
    assert out_bf.shape == (N, Dout) and out_bf.dtype == jnp.float32
    assert bool(jnp.allclose(out_bf, ref, atol=1e-1, rtol=1e-1)), "bf16 mismatch"

    # 2) f32 compute path (tight tolerance).
    w1_f, w2_f, plan_f = prepare_weights(w1, w2, compute_dtype=jnp.float32)
    out_f = jax.block_until_ready(znn_forward(x, w1_f, w2_f, plan=plan_f))
    assert bool(jnp.allclose(out_f, ref, atol=5e-3, rtol=5e-3)), "f32 mismatch"

    # 3) Force the H-tiled reduction / accumulator path (n_h > 1).
    w1_h, w2_h, plan_h = prepare_weights(w1, w2, compute_dtype=jnp.float32,
                                         max_h_tile=128)
    assert plan_h.h_p // plan_h.th >= 2
    out_h = jax.block_until_ready(znn_forward(x, w1_h, w2_h, plan=plan_h))
    assert bool(jnp.allclose(out_h, ref, atol=5e-3, rtol=5e-3)), "H-tiled mismatch"

    # 4) Ragged shapes: Din lane pad + partial tail row block (N=12, tm=8).
    Ns, Dins, Hs, Douts = 12, 32, 64, 16
    xs = jax.random.normal(kx, (Ns, Dins), dtype=jnp.float32)
    w1s = jax.random.normal(k1, (Hs, Dins), dtype=jnp.float32) * 0.1
    w2s = jax.random.normal(k2, (Douts, Hs), dtype=jnp.float32) * 0.1
    w1sp, w2sp, plans = prepare_weights(w1s, w2s, compute_dtype=jnp.float32)
    outs = jax.block_until_ready(znn_forward(xs, w1sp, w2sp, plan=plans))
    refs = _reference(xs, w1s, w2s)
    assert outs.shape == (Ns, Douts)
    assert bool(jnp.allclose(outs, refs, atol=5e-3, rtol=5e-3)), "ragged mismatch"

    print("KERNEL_OK")
</pallas_src>

<mosaic_0001>
module attributes {stable_mosaic.version = 11 : i64} {
  func.func @_znn_kernel(%arg0: i32, %arg1: i32, %arg2: memref<128x128xbf16, #tpu.memory_space<vmem>>, %arg3: memref<128x256xbf16, #tpu.memory_space<vmem>>, %arg4: memref<256x128xbf16, #tpu.memory_space<vmem>>, %arg5: memref<128x128xf32, #tpu.memory_space<vmem>>, %arg6: memref<128x128xf32, #tpu.memory_space<vmem>>) attributes {dimension_semantics = [#tpu.dimension_semantics<parallel>, #tpu.dimension_semantics<arbitrary>], iteration_bounds = array<i64: 2, 1>, scalar_prefetch = 0 : i64, scratch_operands = 1 : i64, tpu.core_type = #tpu.core_type<tc>, window_params = [{transform_indices = @transform_0, window_bounds = array<i64: 128, 128>}, {transform_indices = @transform_1, window_bounds = array<i64: 128, 256>}, {transform_indices = @transform_2, window_bounds = array<i64: 256, 128>}, {transform_indices = @transform_3, window_bounds = array<i64: 128, 128>}]} {
    %c0_i32 = arith.constant 0 : i32
    %0 = arith.cmpi eq, %arg1, %c0_i32 : i32
    %1 = arith.extui %0 : i1 to i32
    %c0_i32_0 = arith.constant 0 : i32
    %2 = arith.cmpi ne, %1, %c0_i32_0 : i32
    scf.if %2 {
      %cst_14 = arith.constant 0.000000e+00 : f32
      %17 = vector.broadcast %cst_14 : f32 to vector<128x128xf32>
      %c0_15 = arith.constant 0 : index
      %c0_16 = arith.constant 0 : index
      %18 = vector.load %arg6[%c0_15, %c0_16] : memref<128x128xf32, #tpu.memory_space<vmem>>, vector<128x128xf32>
      tpu.vector_store %arg6[%c0_15, %c0_16], %17 {strides = array<i32>} : memref<128x128xf32, #tpu.memory_space<vmem>>, vector<128x128xf32>,
    } else {
    }
    %c0 = arith.constant 0 : index
    %c0_1 = arith.constant 0 : index
    %3 = vector.load %arg2[%c0, %c0_1] : memref<128x128xbf16, #tpu.memory_space<vmem>>, vector<128x128xbf16>
    %c0_2 = arith.constant 0 : index
    %c0_3 = arith.constant 0 : index
    %4 = vector.load %arg3[%c0_2, %c0_3] : memref<128x256xbf16, #tpu.memory_space<vmem>>, vector<128x256xbf16>
    %cst = arith.constant dense<0.000000e+00> : vector<128x256xf32>
    %5 = tpu.matmul %3, %4, %cst {dimension_numbers = #tpu.dot_dimension_numbers<[1], [0], [0], [1], [0, 0, 1, 1], [], []>} : vector<128x128xbf16>, vector<128x256xbf16>, vector<128x256xf32> -> vector<128x256xf32>
    %cst_4 = arith.constant 0.000000e+00 : f32
    %6 = vector.broadcast %cst_4 : f32 to vector<128x256xf32>
    %7 = arith.maximumf %5, %6 : vector<128x256xf32>
    %8 = arith.truncf %7 : vector<128x256xf32> to vector<128x256xbf16>
    %c0_5 = arith.constant 0 : index
    %c0_6 = arith.constant 0 : index
    %9 = vector.load %arg6[%c0_5, %c0_6] : memref<128x128xf32, #tpu.memory_space<vmem>>, vector<128x128xf32>
    %c0_7 = arith.constant 0 : index
    %c0_8 = arith.constant 0 : index
    %10 = vector.load %arg4[%c0_7, %c0_8] : memref<256x128xbf16, #tpu.memory_space<vmem>>, vector<256x128xbf16>
    %cst_9 = arith.constant dense<0.000000e+00> : vector<128x128xf32>
    %11 = tpu.matmul %8, %10, %cst_9 {dimension_numbers = #tpu.dot_dimension_numbers<[1], [0], [0], [1], [0, 0, 1, 1], [], []>} : vector<128x256xbf16>, vector<256x128xbf16>, vector<128x128xf32> -> vector<128x128xf32>
    %12 = arith.addf %9, %11 : vector<128x128xf32>
    %c0_10 = arith.constant 0 : index
    %c0_11 = arith.constant 0 : index
    %13 = vector.load %arg6[%c0_10, %c0_11] : memref<128x128xf32, #tpu.memory_space<vmem>>, vector<128x128xf32>
    tpu.vector_store %arg6[%c0_10, %c0_11], %12 {strides = array<i32>} : memref<128x128xf32, #tpu.memory_space<vmem>>, vector<128x128xf32>,
    %c0_i32_12 = arith.constant 0 : i32
    %14 = arith.cmpi eq, %arg1, %c0_i32_12 : i32
    %15 = arith.extui %14 : i1 to i32
    %c0_i32_13 = arith.constant 0 : i32
    %16 = arith.cmpi ne, %15, %c0_i32_13 : i32
    scf.if %16 {
      %c0_14 = arith.constant 0 : index
      %c0_15 = arith.constant 0 : index
      %17 = vector.load %arg6[%c0_14, %c0_15] : memref<128x128xf32, #tpu.memory_space<vmem>>, vector<128x128xf32>
      %c0_16 = arith.constant 0 : index
      %c0_17 = arith.constant 0 : index
      %18 = vector.load %arg5[%c0_16, %c0_17] : memref<128x128xf32, #tpu.memory_space<vmem>>, vector<128x128xf32>
      tpu.vector_store %arg5[%c0_16, %c0_17], %17 {strides = array<i32>} : memref<128x128xf32, #tpu.memory_space<vmem>>, vector<128x128xf32>,
    } else {
    }
    return
  }
  func.func @transform_0(%arg0: i32, %arg1: i32) -> (i32, i32) {
    %c0_i32 = arith.constant 0 : i32
    %c0_i32_0 = arith.constant 0 : i32
    return %arg0, %c0_i32 : i32, i32
  }
  func.func @transform_1(%arg0: i32, %arg1: i32) -> (i32, i32) {
    %c0_i32 = arith.constant 0 : i32
    %c0_i32_0 = arith.constant 0 : i32
    return %c0_i32, %arg1 : i32, i32
  }
  func.func @transform_2(%arg0: i32, %arg1: i32) -> (i32, i32) {
    %c0_i32 = arith.constant 0 : i32
    %c0_i32_0 = arith.constant 0 : i32
    return %arg1, %c0_i32 : i32, i32
  }
  func.func @transform_3(%arg0: i32, %arg1: i32) -> (i32, i32) {
    %c0_i32 = arith.constant 0 : i32
    %c0_i32_0 = arith.constant 0 : i32
    return %arg0, %c0_i32 : i32, i32
  }
}

</mosaic_0001>

<bundles_post_ra>
// kernel: znn_forward.1
= control target key start
LH: loop header
LB: loop body
LE: loop exit
PB: predicated region body
PF: predicated region fallthrough
CT: control target
= control target key end

     0   :  { %8 = vsyncpa [#allocation4], 0  ;;  %s1570_s0 = inlined_call_operand.vmem [shape: bf16[256,128], index: 0, kind: input, shape index: {}]   ;;  %s1571_s1 = inlined_call_operand.vmem [shape: bf16[128,256], index: 1, kind: input, shape index: {}]   ;;  %s1572_s2 = inlined_call_operand.vmem [shape: bf16[256,128], index: 2, kind: input, shape index: {}]   ;;  %s1573_s3 = inlined_call_operand.hbm [shape: f32[256,128], index: 3, kind: output, shape index: {}]  }
   0x1   :  { %10 = vsyncpa [#allocation4 + $0x1], 0  ;;  %s1320_s12 = smov 0   ;;  %s1322_s13 = smov 0  }
   0x2   :  { %s1324_s14 = smov 0   ;;  %s1326_s15 = smov 0  }
   0x3   :  { %s1328_s16 = smov 0   ;;  %s1330_s17 = smov 0  }
   0x4 LB: > { %s992_s18 = sadd.s32 4294967295, %s1294_s17   ;;  %s993_s19 = sadd.s32 4294967294, %s1294_s17   ;;  %s1294_s17 = sphi %s1330_s17, %s16_s17   ;;  %s1290_s16 = sphi %s1328_s16, %s1580_s16   ;;  %s1286_s15 = sphi %s1326_s15, %s1579_s15   ;;  %s1282_s14 = sphi %s1324_s14, %s1578_s14   ;;  %s1278_s13 = sphi %s1322_s13, %s1577_s13   ;;  %s1274_s12 = sphi %s1320_s12, %s1576_s12  }
   0x5   : > { %s28_s20 = sadd.s32 1, %s1290_s16  ;;  %s113_s21 = sadd.s32 1, %s1282_s14 }
   0x6   : > { %p30_p0 = scmp.ge.s32.totalorder %s28_s20, 2  ;;  %p123_p1 = scmp.ne.s32.totalorder %s1282_s14, %s1278_s13 }
   0x7   : > { %p124_p2 = scmp.eq.s32.totalorder %s992_s18, 1  ;;  %p129_p3 = scmp.ne.s32.totalorder %s1278_s13, %s1274_s12 }
   0x8   : > { %s1582_s20 = smov (%p30_p0, %s28_s20), 0  ;;  %p130_p5 = scmp.eq.s32.totalorder %s993_s19, 1 }
   0x9   : > { %p1360_p4 = por %p124_p2, %p123_p1  ;;  %s110_s23 = ssub.s32 %s1290_s16, %s1582_s20 }
   0xa   : > { %p998_p6 = scmp.ge.s32.totalorder %s1294_s17, 1  ;;  %p111_p7 = scmp.eq.s32.totalorder %s110_s23, 0 }
   0xb   : > { %p1367_p8 = por %p130_p5, %p129_p3  ;;  %p175_p9 = scmp.lt.s32.totalorder %s1294_s17, 3 }
   0xc   : > { %s1373_s25 = scalar_select %p111_p7, %s1282_s14, %s113_s21  }
   0xd   : > { %p176_p10 = pnand %p998_p6, %p175_p9 }
   0xe   : > { %s1000_s28 = sshll.u32 (!%p176_p10), %s1286_s15, 4  ;;  %s206_s30 = sand.u32 (!%p176_p10), 1, %s1278_s13  }
   0xf   : > { %179 = sbr.rel (%p176_p10) target bundleno = 528 (0x210), region = 32  ;;  %p210_p11 = scmp.lt.s32.totalorder (!%p176_p10), %s1000_s28, 31 }
  0x10   : > { %s1047_s5 = sshll.u32 (!%p176_p10), %s1286_s15, 11  ;;  %s1297_s11 = smov (!%p176_p10), [#allocation3]  }
  0x11   : > { %s1518_s9 = scalar_lea.hbm (!%p176_p10), %s1573_s3, %s1047_s5  ;;  %s1222_s18 = sshll.u32 (!%p176_p10), %s1297_s11, 4  ;;  %s1223_s18 = int_to_ptr.vmem [resolvable:$false] %s1222_s18 }
  0x12   : > { %s1224_s19 = scalar_lea.vmem (!%p176_p10), %s1223_s18, 4096 }
  0x14   : > { %v1170_v0 = vld [vmem:[%s1571_s1 + $0x74] ss:$8 sps:$4 sm:$0xff]   ;;  %v1172_v1 = vld [vmem:[%s1571_s1 + $0x70] ss:$8 sps:$4 sm:$0xff]   ;;  %v1296_v2 = vmov 0   ;;  %s1584_s28 = smov (!%p210_p11, %s1000_s28), 31 }
  0x15   : > { %441 = vmatprep.mubr.bf16.mxu0 %v1296_v2  ;;  %409 = vmatprep.subr.bf16.mxu0 %v1170_v0  ;;  %v1173_v3 = vld [vmem:[%s1571_s1 + $0x64] ss:$8 sps:$4 sm:$0xff]   ;;  %v1175_v4 = vld [vmem:[%s1571_s1 + $0x60] ss:$8 sps:$4 sm:$0xff]   ;;  %v1176_v5 = vld [vmem:[%s1571_s1 + $0x54] ss:$8 sps:$4 sm:$0xff]  }
  0x16   : > { %410 = vmatpush1.bf16.msra.mxu0 %v1172_v1  ;;  %s1001_s10 = sshll.u32 %s1584_s28, 2  ;;  %v1178_v6 = vld [vmem:[%s1571_s1 + $0x50] ss:$8 sps:$4 sm:$0xff]   ;;  %v1179_v7 = vld [vmem:[%s1571_s1 + $0x44] ss:$8 sps:$4 sm:$0xff]   ;;  %s999_s28 = sshll.u32 %s206_s30, 7 }
  0x17   : > { %411 = vmatprep.subr.bf16.mxu0 %v1173_v3  ;;  %s1401_s27 = scalar_lea.vmem %s1570_s0, %s1001_s10  ;;  %v1181_v8 = vld [vmem:[%s1571_s1 + $0x40] ss:$8 sps:$4 sm:$0xff]   ;;  %v1182_v9 = vld [vmem:[%s1571_s1 + $0x34] ss:$8 sps:$4 sm:$0xff]   ;;  %v1184_v10 = vld [vmem:[%s1571_s1 + $0x30] ss:$8 sps:$4 sm:$0xff]  }
  0x18   : > { %v1185_v11 = vld [vmem:[%s1571_s1 + $0x24] ss:$8 sps:$4 sm:$0xff]   ;;  %v1187_v12 = vld [vmem:[%s1571_s1 + $0x20] ss:$8 sps:$4 sm:$0xff]   ;;  %v1188_v13 = vld [vmem:[%s1571_s1 + $0x14] ss:$8 sps:$4 sm:$0xff]  }
  0x19   : > { %v1202_v14 = vld [vmem:[%s1572_s2 + $0x78] sm:$0xff]   ;;  %v1204_v17 = vld [vmem:[%s1572_s2 + $0x70] sm:$0xff]   ;;  %v1206_v19 = vld [vmem:[%s1572_s2 + $0x68] sm:$0xff]   ;;  %s1496_s4 = scalar_lea.vmem [#allocation3], %s999_s28  ;;  %s1525_s10 = scalar_lea.sflag [#allocation4], %s206_s30 }
  0x1a   : > { %412 = vmatpush1.bf16.msra.mxu0 %v1175_v4  ;;  %v1203_v15 = vld [vmem:[%s1572_s2 + $0x38] sm:$0xff]   ;;  %1048 = vmatprep.subr.bf16.mxu1 %v1202_v14  ;;  %v1205_v18 = vld [vmem:[%s1572_s2 + $0x30] sm:$0xff]   ;;  %v1191_v20 = vld [vmem:[%s1571_s1 + $0x4] ss:$8 sps:$4 sm:$0xff]   ;;  %s892_s6 = sshll.u32 %s1496_s4, 4  ;;  %s1520_s6 = int_to_ptr.vmem [resolvable:$true] %s892_s6 }
  0x1b   : > { %413 = vmatprep.subr.bf16.mxu0 %v1176_v5  ;;  %v1190_v16 = vld [vmem:[%s1571_s1 + $0x10] ss:$8 sps:$4 sm:$0xff]   ;;  %1049 = vmatpush3.bf16.msra.mxu1 %v1203_v15  ;;  %v1193_v21 = vld [vmem:[%s1571_s1] ss:$8 sps:$4 sm:$0xff]   ;;  %s1218_s15 = scalar_lea.vmem %s1520_s6, 2048  ;;  %p1225_p1 = scmp.lt.s32.totalorder %s1520_s6, %s1223_s18 }
  0x1c   : > { %1050 = vmatprep.subr.bf16.mxu1 %v1204_v17  ;;  %v1207_v22 = vld [vmem:[%s1572_s2 + $0x28] sm:$0xff]   ;;  %v1208_v23 = vld [vmem:[%s1572_s2 + $0x60] sm:$0xff]   ;;  %v1210_v26 = vld [vmem:[%s1572_s2 + $0x58] sm:$0xff]   ;;  %p1219_p12 = scmp.ne.s32.totalorder %s1520_s6, %s1218_s15  ;;  %p1226_p2 = scmp.lt.s32.totalorder %s1224_s19, %s1218_s15 }
  0x1d   : > { %v1194_v24 = vld [vmem:[%s1401_s27] sm:$0xff]   ;;  %v1211_v27 = vld [vmem:[%s1572_s2 + $0x18] sm:$0xff]   ;;  %v1195_v28 = vld [vmem:[%s1401_s27 + $0x8] sm:$0xff]  }
  0x1e   : > { %414 = vmatpush1.bf16.msra.mxu0 %v1178_v6  ;;  %v1209_v25 = vld [vmem:[%s1572_s2 + $0x20] sm:$0xff]   ;;  %v1196_v29 = vld [vmem:[%s1401_s27 + $0x10] sm:$0xff]   ;;  %v1197_v30 = vld [vmem:[%s1401_s27 + $0x18] sm:$0xff]   ;;  %p1220_p13 = pnand %p1219_p12, %p1360_p4  ;;  %p1227_p3 = por %p1226_p2, %p1225_p1 }
  0x1f   : > { %415 = vmatprep.subr.bf16.mxu0 %v1179_v7  ;;  %1051 = vmatpush3.bf16.msra.mxu1 %v1205_v18  ;;  %v1198_v31 = vld [vmem:[%s1401_s27 + $0x20] sm:$0xff]   ;;  %v1199_v32 = vld [vmem:[%s1401_s27 + $0x28] sm:$0xff]   ;;  %v1200_v33 = vld [vmem:[%s1401_s27 + $0x30] sm:$0xff]  }
  0x20   : > { %1052 = vmatprep.subr.bf16.mxu1 %v1206_v19  ;;  %v1201_v34 = vld [vmem:[%s1401_s27 + $0x38] sm:$0xff]   ;;  %v1212_v35 = vld [vmem:[%s1572_s2 + $0x50] sm:$0xff]   ;;  %v1214_v37 = vld [vmem:[%s1572_s2 + $0x48] sm:$0xff]   ;;  %p1221_p0 = pneg %p1220_p13 }
  0x21   : > { %v1213_v36 = vld [vmem:[%s1572_s2 + $0x10] sm:$0xff]   ;;  %v1215_v38 = vld [vmem:[%s1572_s2 + $0x8] sm:$0xff]   ;;  %v1216_v39 = vld [vmem:[%s1572_s2 + $0x40] sm:$0xff]  }
  0x22   : > { %416 = vmatpush1.bf16.msra.mxu0 %v1181_v8  ;;  %v1217_v40 = vld [vmem:[%s1572_s2] sm:$0xff]   ;;  %p1228_p5 = pnand %p1227_p3, %p1221_p0 }
  0x23   : > { %417 = vmatprep.subr.bf16.mxu0 %v1182_v9  ;;  %1053 = vmatpush3.bf16.msra.mxu1 %v1207_v22 }
  0x24   : > { %1054 = vmatprep.subr.bf16.mxu1 %v1208_v23 }
  0x26   : > { %418 = vmatpush1.bf16.msra.mxu0 %v1184_v10 }
  0x27   : > { %419 = vmatprep.subr.bf16.mxu0 %v1185_v11  ;;  %1055 = vmatpush3.bf16.msra.mxu1 %v1209_v25 }
  0x28   : > { %1056 = vmatprep.subr.bf16.mxu1 %v1210_v26 }
  0x2a   : > { %420 = vmatpush1.bf16.msra.mxu0 %v1187_v12 }
  0x2b   : > { %421 = vmatprep.subr.bf16.mxu0 %v1188_v13  ;;  %1057 = vmatpush3.bf16.msra.mxu1 %v1211_v27 }
  0x2c   : > { %1058 = vmatprep.subr.bf16.mxu1 %v1212_v35 }
  0x2e   : > { %422 = vmatpush1.bf16.msra.mxu0 %v1190_v16 }
  0x2f   : > { %423 = vmatprep.subr.bf16.mxu0 %v1191_v20  ;;  %1059 = vmatpush3.bf16.msra.mxu1 %v1213_v36 }
  0x30   : > { %1060 = vmatprep.subr.bf16.mxu1 %v1214_v37 }
  0x32   : > { %424 = vmatpush1.bf16.msra.mxu0 %v1193_v21 }
  0x33   : > { %1061 = vmatpush3.bf16.msra.mxu1 %v1215_v38 }
  0x34   : > { %1062 = vmatprep.subr.bf16.mxu1 %v1216_v39 }
  0x35   : > { %442 = vmatmul.mubr.bf16.vlgmr.msra.gmra.mxu0 %v1194_v24 }
  0x36   : > { %451 = vmatprep.mubr.bf16.mxu0 %v1296_v2 }
  0x37   : > { %1063 = vmatpush3.bf16.msra.mxu1 %v1217_v40 }
  0x3d   : > { %452 = vmatmul.mubr.bf16.gmra.mxu0 %v1195_v28 }
  0x3e   : > { %461 = vmatprep.mubr.bf16.mxu0 %v1296_v2 }
  0x45   : > { %462 = vmatmul.mubr.bf16.gmra.mxu0 %v1196_v29 }
  0x46   : > { %471 = vmatprep.mubr.bf16.mxu0 %v1296_v2 }
  0x4d   : > { %472 = vmatmul.mubr.bf16.gmra.mxu0 %v1197_v30 }
  0x4e   : > { %481 = vmatprep.mubr.bf16.mxu0 %v1296_v2 }
  0x55   : > { %482 = vmatmul.mubr.bf16.gmra.mxu0 %v1198_v31 }
  0x56   : > { %491 = vmatprep.mubr.bf16.mxu0 %v1296_v2 }
  0x5d   : > { %492 = vmatmul.mubr.bf16.gmra.mxu0 %v1199_v32 }
  0x5e   : > { %501 = vmatprep.mubr.bf16.mxu0 %v1296_v2 }
  0x65   : > { %502 = vmatmul.mubr.bf16.gmra.mxu0 %v1200_v33 }
  0x66   : > { %511 = vmatprep.mubr.bf16.mxu0 %v1296_v2 }
  0x6d   : > { %512 = vmatmul.mubr.bf16.gmra.mxu0 %v1201_v34 }
  0xf5   : > { %v443_v41 = vpop.f32.mrf.mxu0 }
  0xf6   : > { %v522_v48 = vmax.f32 %v443_v41, 0.0 }
  0xf7   : > { %v445_v42 = vpop.f32.mrf.mxu0 }
  0xf8   : > { %v523_v46 = vmax.f32 %v445_v42, 0.0 }
  0xf9   : > { %v447_v43 = vpop.f32.mrf.mxu0 }
  0xfa   : > { %v524_v44 = vmax.f32 %v447_v43, 0.0 }
  0xfb   : > { %v449_v45 = vpop.f32.mrf.mxu0 }
  0xfc   : > { %v525_v47 = vmax.f32 %v449_v45, 0.0  ;;  %v554_v51 = vpack.c.bf16 %v524_v44, %v522_v48 }
  0xfd   : > { %v453_v49 = vpop.f32.mrf.mxu0 }
  0xfe   : > { %v555_v50 = vpack.c.bf16 %v525_v47, %v523_v46  ;;  %v526_v58 = vmax.f32 %v453_v49, 0.0 }
  0xff   : > { %v455_v52 = vpop.f32.mrf.mxu0 }
 0x100   : > { %746 = vmatprep.mubr.bf16.mxu1 %v555_v50  ;;  %v527_v56 = vmax.f32 %v455_v52, 0.0 }
 0x101   : > { %v457_v53 = vpop.f32.mrf.mxu0  ;;  %747 = vmatmul.mubr.bf16.vlgmr.msra.gmra.mxu1 %v554_v51 }
 0x102   : > { %v528_v54 = vmax.f32 %v457_v53, 0.0 }
 0x103   : > { %v459_v55 = vpop.f32.mrf.mxu0 }
 0x104   : > { %v529_v57 = vmax.f32 %v459_v55, 0.0  ;;  %v556_v61 = vpack.c.bf16 %v528_v54, %v526_v58 }
 0x105   : > { %v463_v59 = vpop.f32.mrf.mxu0 }
 0x106   : > { %v557_v60 = vpack.c.bf16 %v529_v57, %v527_v56  ;;  %v530_v4 = vmax.f32 %v463_v59, 0.0 }
 0x107   : > { %v465_v62 = vpop.f32.mrf.mxu0 }
 0x108   : > { %754 = vmatprep.mubr.bf16.mxu1 %v557_v60  ;;  %v531_v2 = vmax.f32 %v465_v62, 0.0 }
 0x109   : > { %v467_v63 = vpop.f32.mrf.mxu0  ;;  %755 = vmatmul.mubr.bf16.gmra.mxu1 %v556_v61 }
 0x10a   : > { %v532_v0 = vmax.f32 %v467_v63, 0.0 }
 0x10b   : > { %v469_v1 = vpop.f32.mrf.mxu0 }
 0x10c   : > { %v533_v3 = vmax.f32 %v469_v1, 0.0  ;;  %v558_v7 = vpack.c.bf16 %v532_v0, %v530_v4 }
 0x10d   : > { %v473_v5 = vpop.f32.mrf.mxu0 }
 0x10e   : > { %v559_v6 = vpack.c.bf16 %v533_v3, %v531_v2  ;;  %v534_v14 = vmax.f32 %v473_v5, 0.0 }
 0x10f   : > { %v475_v8 = vpop.f32.mrf.mxu0 }
 0x110   : > { %762 = vmatprep.mubr.bf16.mxu1 %v559_v6  ;;  %v535_v12 = vmax.f32 %v475_v8, 0.0 }
 0x111   : > { %v477_v9 = vpop.f32.mrf.mxu0  ;;  %763 = vmatmul.mubr.bf16.gmra.mxu1 %v558_v7 }
 0x112   : > { %v536_v10 = vmax.f32 %v477_v9, 0.0 }
 0x113   : > { %v479_v11 = vpop.f32.mrf.mxu0 }
 0x114   : > { %v537_v13 = vmax.f32 %v479_v11, 0.0  ;;  %v560_v17 = vpack.c.bf16 %v536_v10, %v534_v14 }
 0x115   : > { %v483_v15 = vpop.f32.mrf.mxu0 }
 0x116   : > { %v561_v16 = vpack.c.bf16 %v537_v13, %v535_v12  ;;  %v538_v24 = vmax.f32 %v483_v15, 0.0 }
 0x117   : > { %v485_v18 = vpop.f32.mrf.mxu0 }
 0x118   : > { %770 = vmatprep.mubr.bf16.mxu1 %v561_v16  ;;  %v539_v22 = vmax.f32 %v485_v18, 0.0 }
 0x119   : > { %v487_v19 = vpop.f32.mrf.mxu0  ;;  %771 = vmatmul.mubr.bf16.gmra.mxu1 %v560_v17 }
 0x11a   : > { %v540_v20 = vmax.f32 %v487_v19, 0.0 }
 0x11b   : > { %v489_v21 = vpop.f32.mrf.mxu0 }
 0x11c   : > { %v541_v23 = vmax.f32 %v489_v21, 0.0  ;;  %v562_v27 = vpack.c.bf16 %v540_v20, %v538_v24 }
 0x11d   : > { %v493_v25 = vpop.f32.mrf.mxu0 }
 0x11e   : > { %v563_v26 = vpack.c.bf16 %v541_v23, %v539_v22  ;;  %v542_v34 = vmax.f32 %v493_v25, 0.0 }
 0x11f   : > { %v495_v28 = vpop.f32.mrf.mxu0 }
 0x120   : > { %778 = vmatprep.mubr.bf16.mxu1 %v563_v26  ;;  %v543_v32 = vmax.f32 %v495_v28, 0.0 }
 0x121   : > { %v497_v29 = vpop.f32.mrf.mxu0  ;;  %779 = vmatmul.mubr.bf16.gmra.mxu1 %v562_v27 }
 0x122   : > { %v544_v30 = vmax.f32 %v497_v29, 0.0 }
 0x123   : > { %v499_v31 = vpop.f32.mrf.mxu0 }
 0x124   : > { %v545_v33 = vmax.f32 %v499_v31, 0.0  ;;  %v564_v37 = vpack.c.bf16 %v544_v30, %v542_v34 }
 0x125   : > { %v503_v35 = vpop.f32.mrf.mxu0 }
 0x126   : > { %v565_v36 = vpack.c.bf16 %v545_v33, %v543_v32  ;;  %v546_v44 = vmax.f32 %v503_v35, 0.0 }
 0x127   : > { %v505_v38 = vpop.f32.mrf.mxu0 }
 0x128   : > { %786 = vmatprep.mubr.bf16.mxu1 %v565_v36  ;;  %v547_v42 = vmax.f32 %v505_v38, 0.0 }
 0x129   : > { %v507_v39 = vpop.f32.mrf.mxu0  ;;  %787 = vmatmul.mubr.bf16.gmra.mxu1 %v564_v37 }
 0x12a   : > { %v548_v40 = vmax.f32 %v507_v39, 0.0 }
 0x12b   : > { %v509_v41 = vpop.f32.mrf.mxu0 }
 0x12c   : > { %v549_v43 = vmax.f32 %v509_v41, 0.0  ;;  %v566_v47 = vpack.c.bf16 %v548_v40, %v546_v44 }
 0x12d   : > { %v513_v45 = vpop.f32.mrf.mxu0 }
 0x12e   : > { %v567_v46 = vpack.c.bf16 %v549_v43, %v547_v42  ;;  %v550_v54 = vmax.f32 %v513_v45, 0.0 }
 0x12f   : > { %v515_v48 = vpop.f32.mrf.mxu0 }
 0x130   : > { %794 = vmatprep.mubr.bf16.mxu1 %v567_v46  ;;  %v551_v52 = vmax.f32 %v515_v48, 0.0 }
 0x131   : > { %v517_v49 = vpop.f32.mrf.mxu0  ;;  %795 = vmatmul.mubr.bf16.gmra.mxu1 %v566_v47 }
 0x132   : > { %v552_v50 = vmax.f32 %v517_v49, 0.0 }
 0x133   : > { %v519_v51 = vpop.f32.mrf.mxu0 }
 0x134   : > { %v553_v53 = vmax.f32 %v519_v51, 0.0  ;;  %v568_v56 = vpack.c.bf16 %v552_v50, %v550_v54 }
 0x136   : > { %v569_v55 = vpack.c.bf16 %v553_v53, %v551_v52 }
 0x138   : > { %802 = vmatprep.mubr.bf16.mxu1 %v569_v55 }
 0x139   : > { %803 = vmatmul.mubr.bf16.gmra.mxu1 %v568_v56 }
 0x1c1   : > { %v1064_v57 = vpop.f32.mrf.mxu1 }
 0x1c3   : > { %v1065_v58 = vpop.f32.mrf.mxu1 }
 0x1c4   : > { %v1066_v59 = vadd.f32 %v1065_v58, %v1064_v57 }
 0x1c5   : > { %v1067_v60 = vpop.f32.mrf.mxu1 }
 0x1c6   : > { %862 = vst [vmem:[%s1496_s4] sm:$0xff] %v1066_v59 }
 0x1c7   : > { %v1068_v61 = vpop.f32.mrf.mxu1 }
 0x1c8   : > { %v1069_v62 = vadd.f32 %v1068_v61, %v1067_v60 }
 0x1c9   : > { %v1070_v63 = vpop.f32.mrf.mxu1 }
 0x1ca   : > { %863 = vst [vmem:[%s1496_s4 + $0x8] sm:$0xff] %v1069_v62 }
 0x1cb   : > { %v1071_v0 = vpop.f32.mrf.mxu1 }
 0x1cc   : > { %v1072_v1 = vadd.f32 %v1071_v0, %v1070_v63 }
 0x1cd   : > { %v1073_v2 = vpop.f32.mrf.mxu1 }
 0x1ce   : > { %864 = vst [vmem:[%s1496_s4 + $0x10] sm:$0xff] %v1072_v1 }
 0x1cf   : > { %v1074_v3 = vpop.f32.mrf.mxu1 }
 0x1d0   : > { %v1075_v4 = vadd.f32 %v1074_v3, %v1073_v2 }
 0x1d1   : > { %v1076_v5 = vpop.f32.mrf.mxu1 }
 0x1d2   : > { %865 = vst [vmem:[%s1496_s4 + $0x18] sm:$0xff] %v1075_v4 }
 0x1d3   : > { %v1077_v6 = vpop.f32.mrf.mxu1 }
 0x1d4   : > { %v1078_v7 = vadd.f32 %v1077_v6, %v1076_v5 }
 0x1d5   : > { %v1079_v8 = vpop.f32.mrf.mxu1 }
 0x1d6   : > { %866 = vst [vmem:[%s1496_s4 + $0x20] sm:$0xff] %v1078_v7 }
 0x1d7   : > { %v1080_v9 = vpop.f32.mrf.mxu1 }
 0x1d8   : > { %v1081_v10 = vadd.f32 %v1080_v9, %v1079_v8 }
 0x1d9   : > { %v1082_v11 = vpop.f32.mrf.mxu1 }
 0x1da   : > { %867 = vst [vmem:[%s1496_s4 + $0x28] sm:$0xff] %v1081_v10 }
 0x1db   : > { %v1083_v12 = vpop.f32.mrf.mxu1 }
 0x1dc   : > { %v1084_v13 = vadd.f32 %v1083_v12, %v1082_v11 }
 0x1dd   : > { %v1085_v14 = vpop.f32.mrf.mxu1 }
 0x1de   : > { %868 = vst [vmem:[%s1496_s4 + $0x30] sm:$0xff] %v1084_v13 }
 0x1df   : > { %v1086_v15 = vpop.f32.mrf.mxu1 }
 0x1e0   : > { %v1087_v16 = vadd.f32 %v1086_v15, %v1085_v14 }
 0x1e1   : > { %v1088_v17 = vpop.f32.mrf.mxu1 }
 0x1e2   : > { %869 = vst [vmem:[%s1496_s4 + $0x38] sm:$0xff] %v1087_v16 }
 0x1e3   : > { %v1089_v18 = vpop.f32.mrf.mxu1 }
 0x1e4   : > { %v1090_v19 = vadd.f32 %v1089_v18, %v1088_v17 }
 0x1e5   : > { %v1091_v20 = vpop.f32.mrf.mxu1 }
 0x1e6   : > { %870 = vst [vmem:[%s1496_s4 + $0x40] sm:$0xff] %v1090_v19 }
 0x1e7   : > { %v1092_v21 = vpop.f32.mrf.mxu1 }
 0x1e8   : > { %v1093_v22 = vadd.f32 %v1092_v21, %v1091_v20 }
 0x1e9   : > { %v1094_v23 = vpop.f32.mrf.mxu1 }
 0x1ea   : > { %871 = vst [vmem:[%s1496_s4 + $0x48] sm:$0xff] %v1093_v22 }
 0x1eb   : > { %v1095_v24 = vpop.f32.mrf.mxu1 }
 0x1ec   : > { %v1096_v25 = vadd.f32 %v1095_v24, %v1094_v23 }
 0x1ed   : > { %v1097_v26 = vpop.f32.mrf.mxu1 }
 0x1ee   : > { %872 = vst [vmem:[%s1496_s4 + $0x50] sm:$0xff] %v1096_v25 }
 0x1ef   : > { %v1098_v27 = vpop.f32.mrf.mxu1 }
 0x1f0   : > { %v1099_v28 = vadd.f32 %v1098_v27, %v1097_v26 }
 0x1f1   : > { %v1100_v29 = vpop.f32.mrf.mxu1 }
 0x1f2   : > { %873 = vst [vmem:[%s1496_s4 + $0x58] sm:$0xff] %v1099_v28 }
 0x1f3   : > { %v1101_v30 = vpop.f32.mrf.mxu1 }
 0x1f4   : > { %v1102_v31 = vadd.f32 %v1101_v30, %v1100_v29 }
 0x1f5   : > { %v1103_v32 = vpop.f32.mrf.mxu1 }
 0x1f6   : > { %874 = vst [vmem:[%s1496_s4 + $0x60] sm:$0xff] %v1102_v31 }
 0x1f7   : > { %v1104_v33 = vpop.f32.mrf.mxu1 }
 0x1f8   : > { %v1105_v34 = vadd.f32 %v1104_v33, %v1103_v32 }
 0x1f9   : > { %v1106_v35 = vpop.f32.mrf.mxu1 }
 0x1fa   : > { %875 = vst [vmem:[%s1496_s4 + $0x68] sm:$0xff] %v1105_v34 }
 0x1fb   : > { %v1107_v36 = vpop.f32.mrf.mxu1 }
 0x1fc   : > { %v1108_v37 = vadd.f32 %v1107_v36, %v1106_v35 }
 0x1fd   : > { %v1109_v38 = vpop.f32.mrf.mxu1 }
 0x1fe   : > { %876 = vst [vmem:[%s1496_s4 + $0x70] sm:$0xff] %v1108_v37 }
 0x1ff   : > { %v1110_v39 = vpop.f32.mrf.mxu1 }
 0x200   : > { %v1111_v40 = vadd.f32 %v1110_v39, %v1109_v38 }
 0x202   : > { %877 = vst [vmem:[%s1496_s4 + $0x78] sm:$0xff] %v1111_v40 }
 0x203   : > { %1231 = shalt.err (!%p1228_p5)
}
 0x204   : > { %s1232_s21 = scalar_lea.hbm %s1518_s9, 2048  ;;  %s1236_s26 = scalar_lea.hbm %s1573_s3, 4096 }
 0x205   : > { %p1233_p6 = scmp.ne.s32.totalorder %s1518_s9, %s1232_s21  ;;  %p1237_p10 = scmp.lt.s32.totalorder %s1518_s9, %s1573_s3 }
 0x206   : > { %p1238_p11 = scmp.lt.s32.totalorder %s1236_s26, %s1232_s21 }
 0x207   : > { %p1234_p7 = pnand %p1233_p6, %p1360_p4 }
 0x208   : > { %p1239_p12 = por %p1238_p11, %p1237_p10 }
 0x209   : > { %p1235_p9 = pneg %p1234_p7 }
 0x20b   : > { %p1240_p13 = pnand %p1239_p12, %p1235_p9 }
 0x20d   : > { %1243 = shalt.err (!%p1240_p13)
}
 0x20e   : > { %s1298_s28 = smov 128   ;;  %s1299_s4 = smov 8  }
 0x20f   : > { %1112 = dma.vmem_to_hbm [thread:$0]  (%p1360_p4), %s1520_s6, 2048, %s1518_s9, %s1525_s10, %s1298_s28, %s1298_s28, %s1299_s4  }
 0x210 PF: > { %p1118_p0 = scmp.ge.s32.totalorder %s1294_s17, 2  ;;  %s907_s5 = sand.u32 1, %s1274_s12  }
 0x211   : > { %s908_s7 = scalar_lea.sflag [#allocation4], %s907_s5 }
 0x212   : > { %p1115_p1 = pnand %p1118_p0, %p1367_p8 }
 0x214   : > { %p1116_p2 = pneg %p1115_p1 }
 0x216   : > { %1269 = dma.done.wait (%p1116_p2), %s908_s7, 2048  }
 0x217   : > { %1271 = vsyncadd (%p1116_p2), %s908_s7, 4294965248  ;;  %s16_s17 = sadd.s32 1, %s1294_s17   ;;  %s1576_s12 = smov %s1278_s13 }
 0x218   : > { %p13_p3 = scmp.ge.s32.totalorder %s16_s17, 4   ;;  %s1577_s13 = smov %s1282_s14 }
 0x219   : > { %s1578_s14 = smov %s1373_s25  ;;  %s1579_s15 = smov %s1290_s16 }
 0x21a   : > { %s1580_s16 = smov %s1582_s20  ;;  %15 = sbr.rel (!%p13_p3) target bundleno = 4 (0x4), region = 81 }
 0x21f   :  { %913 = vsyncpa [#allocation4], 1 }
 0x220   :  { %915 = vsyncpa [#allocation4 + $0x1], 1 }

</bundles_post_ra>
